<compile_context>
chip_gen: v7x
topology: tpu7x:2x2x1
jax: 0.10.0
libtpu: 0.0.40
codegen_flags: <defaults>
</compile_context>

<pallas_src>
import functools

import jax
import jax.numpy as jnp
from jax.experimental import pallas as pl
from jax.experimental.pallas import tpu as pltpu

_SUBLANE = 8
_HID1 = 128
_HID2 = 64


def _round_up(n, m):
    return ((n + m - 1) // m) * m


def _mlp_kernel(x_ref, w1_ref, b1_ref, w2_ref, b2_ref, w3_ref, b3_ref, o_ref):
    # In-register downcast of the activations (VPU work hidden under DMA / MXU);
    # all matmuls accumulate in f32, bias-add / ReLU stay in f32.
    x = x_ref[...].astype(w1_ref.dtype)
    # Layer 1: (tb, S) @ (S, 128) + (1, 128), ReLU
    h1 = jnp.dot(x, w1_ref[...], preferred_element_type=jnp.float32)
    h1 = jnp.maximum(h1 + b1_ref[...], 0.0)
    # Layer 2: (tb, 128) @ (128, 64) + (1, 64), ReLU
    h2 = jnp.dot(h1.astype(w2_ref.dtype), w2_ref[...],
                 preferred_element_type=jnp.float32)
    h2 = jnp.maximum(h2 + b2_ref[...], 0.0)
    # Layer 3 (logits): (tb, 64) @ (64, A) + (1, A)   -- un-padded, masked store
    logits = jnp.dot(h2.astype(w3_ref.dtype), w3_ref[...],
                     preferred_element_type=jnp.float32)
    o_ref[...] = (logits + b3_ref[...]).astype(o_ref.dtype)


def pack_params(w1, b1, w2, b2, w3, b3, *, use_bf16=True):
    """One-time parameter packing (do this OUTSIDE the RL hot loop).

    Weights -> compute dtype (bf16 by default), biases -> f32, shapes unchanged
    (W: (in, out), b: (1, out)). Returns a tuple to splat into pg_forward.
    """
    wdt = jnp.bfloat16 if use_bf16 else jnp.float32
    return (w1.astype(wdt), b1.astype(jnp.float32),
            w2.astype(wdt), b2.astype(jnp.float32),
            w3.astype(wdt), b3.astype(jnp.float32))


@functools.partial(jax.jit, static_argnames=("block_b",))
def pg_forward(x, w1, b1, w2, b2, w3, b3, *, block_b=None):
    """Forward pass of PG with pre-packed params. Returns f32 logits (B, n_actions)."""
    B, S = x.shape
    A = w3.shape[1]

    # --- tile sizing -------------------------------------------------------
    # Default: split the batch into (at least) 2 big tiles, capped at 2048 rows,
    # always a multiple of 8 sublanes.  >=2 grid steps lets the "parallel" axis
    # shard across v7x's two TensorCores; 2048-row tiles keep per-step pipeline
    # overhead negligible at large B while using < 1 MiB of double-buffered VMEM.
    if block_b is None:
        half = _round_up(pl.cdiv(_round_up(B, _SUBLANE), 2), _SUBLANE)
        block_b = min(2048, max(_SUBLANE, half))
    else:
        block_b = max(_SUBLANE, _round_up(block_b, _SUBLANE))
    block_b = min(block_b, _round_up(B, _SUBLANE))

    grid = (pl.cdiv(B, block_b),)

    def full(arr):
        # Whole-array block, constant index_map -> resident across the grid.
        return pl.BlockSpec(arr.shape, lambda i: (0, 0))

    flops = 2 * B * (S * _HID1 + _HID1 * _HID2 + _HID2 * A)
    bytes_accessed = (
        x.size * x.dtype.itemsize
        + sum(p.size * p.dtype.itemsize for p in (w1, b1, w2, b2, w3, b3))
        + B * A * 4
    )

    out = pl.pallas_call(
        _mlp_kernel,
        out_shape=jax.ShapeDtypeStruct((B, A), jnp.float32),
        grid_spec=pltpu.PrefetchScalarGridSpec(
            num_scalar_prefetch=0,
            grid=grid,
            in_specs=[
                pl.BlockSpec((block_b, S), lambda i: (i, 0)),   # x tile (native dtype)
                full(w1), full(b1),                             # layer 1 params
                full(w2), full(b2),                             # layer 2 params
                full(w3), full(b3),                             # layer 3 params
            ],
            out_specs=pl.BlockSpec((block_b, A), lambda i: (i, 0)),  # un-padded logits
        ),
        compiler_params=pltpu.CompilerParams(
            dimension_semantics=("parallel",),
        ),
        cost_estimate=pl.CostEstimate(
            flops=flops, transcendentals=0, bytes_accessed=bytes_accessed),
    )(x, w1, b1, w2, b2, w3, b3)

    return out


def init_params(key, state_shape, n_actions):
    """Deterministic synthetic parameters (shapes match nn.Linear layers)."""
    ks = jax.random.split(key, 6)

    def lin(kw, kb, fan_in, fan_out):
        bound = 1.0 / jnp.sqrt(fan_in)
        w = jax.random.uniform(kw, (fan_in, fan_out), jnp.float32, -bound, bound)
        b = jax.random.uniform(kb, (1, fan_out), jnp.float32, -bound, bound)
        return w, b

    w1, b1 = lin(ks[0], ks[1], state_shape, _HID1)
    w2, b2 = lin(ks[2], ks[3], _HID1, _HID2)
    w3, b3 = lin(ks[4], ks[5], _HID2, n_actions)
    return w1, b1, w2, b2, w3, b3


def reference_forward(x, w1, b1, w2, b2, w3, b3, use_bf16=True):
    """Precision-matched JAX reference (same bf16-in / f32-accumulate recipe)."""
    cdt = jnp.bfloat16 if use_bf16 else jnp.float32
    h1 = jnp.dot(x.astype(cdt), w1.astype(cdt),
                 preferred_element_type=jnp.float32) + b1
    h1 = jnp.maximum(h1, 0.0)
    h2 = jnp.dot(h1.astype(cdt), w2.astype(cdt),
                 preferred_element_type=jnp.float32) + b2
    h2 = jnp.maximum(h2, 0.0)
    return jnp.dot(h2.astype(cdt), w3.astype(cdt),
                   preferred_element_type=jnp.float32) + b3


if __name__ == "__main__":
    key = jax.random.PRNGKey(0)
    k_x, k_p = jax.random.split(key)

    batch = 20          # deliberately NOT a multiple of 8 -> exercises the ragged-tail path
    state_shape = 32
    n_actions = 8

    x = jax.random.normal(k_x, (batch, state_shape), dtype=jnp.float32)
    params = init_params(k_p, state_shape, n_actions)

    # --- bf16 compute path (default) ---------------------------------------
    packed = pack_params(*params, use_bf16=True)            # packed once, reused per call
    ref = reference_forward(x, *params, use_bf16=True)

    logits = pg_forward(x, *packed)                          # default tiling, grid=(2,)
    logits = jax.block_until_ready(logits)
    assert logits.shape == (batch, n_actions)
    assert jnp.allclose(logits, ref, atol=1e-3, rtol=1e-3), "mismatch vs reference (default tile)"

    # Multi-step grid with a partial last block (20 rows / 8-row tiles -> grid=(3,)).
    logits_small = pg_forward(x, *packed, block_b=8)
    logits_small = jax.block_until_ready(logits_small)
    assert jnp.allclose(logits_small, ref, atol=1e-3, rtol=1e-3), "mismatch vs reference (block_b=8)"

    # --- pure f32 path -------------------------------------------------------
    packed_f32 = pack_params(*params, use_bf16=False)
    ref_f32 = reference_forward(x, *params, use_bf16=False)
    logits_f32 = pg_forward(x, *packed_f32)
    logits_f32 = jax.block_until_ready(logits_f32)
    assert jnp.allclose(logits_f32, ref_f32, atol=1e-5, rtol=1e-5), "mismatch vs f32 reference"

    # TODO(synk): env-interaction / training methods (predict_probs softmax sampling,
    # generate_session, train_on_env, optimizer step, save/load) are host-side RL loop
    # code and are not kernel material.
    print("KERNEL_OK")
</pallas_src>

<mosaic_0001>
module attributes {stable_mosaic.version = 11 : i64} {
  func.func @_mlp_kernel(%arg0: i32, %arg1: memref<16x32xf32, #tpu.memory_space<vmem>>, %arg2: memref<32x128xbf16, #tpu.memory_space<vmem>>, %arg3: memref<1x128xf32, #tpu.memory_space<vmem>>, %arg4: memref<128x64xbf16, #tpu.memory_space<vmem>>, %arg5: memref<1x64xf32, #tpu.memory_space<vmem>>, %arg6: memref<64x8xbf16, #tpu.memory_space<vmem>>, %arg7: memref<1x8xf32, #tpu.memory_space<vmem>>, %arg8: memref<16x8xf32, #tpu.memory_space<vmem>>) attributes {dimension_semantics = [#tpu.dimension_semantics<parallel>], iteration_bounds = array<i64: 2>, scalar_prefetch = 0 : i64, scratch_operands = 0 : i64, tpu.core_type = #tpu.core_type<tc>, window_params = [{transform_indices = @transform_0, window_bounds = array<i64: 16, 32>}, {pipeline_mode = #tpu.pipeline_mode<synchronous>, transform_indices = @transform_1, window_bounds = array<i64: 32, 128>}, {pipeline_mode = #tpu.pipeline_mode<synchronous>, transform_indices = @transform_2, window_bounds = array<i64: 1, 128>}, {pipeline_mode = #tpu.pipeline_mode<synchronous>, transform_indices = @transform_3, window_bounds = array<i64: 128, 64>}, {pipeline_mode = #tpu.pipeline_mode<synchronous>, transform_indices = @transform_4, window_bounds = array<i64: 1, 64>}, {pipeline_mode = #tpu.pipeline_mode<synchronous>, transform_indices = @transform_5, window_bounds = array<i64: 64, 8>}, {pipeline_mode = #tpu.pipeline_mode<synchronous>, transform_indices = @transform_6, window_bounds = array<i64: 1, 8>}, {transform_indices = @transform_7, window_bounds = array<i64: 16, 8>}]} {
    %c0 = arith.constant 0 : index
    %c0_0 = arith.constant 0 : index
    %0 = vector.load %arg1[%c0, %c0_0] : memref<16x32xf32, #tpu.memory_space<vmem>>, vector<16x32xf32>
    %1 = arith.truncf %0 : vector<16x32xf32> to vector<16x32xbf16>
    %c0_1 = arith.constant 0 : index
    %c0_2 = arith.constant 0 : index
    %2 = vector.load %arg2[%c0_1, %c0_2] : memref<32x128xbf16, #tpu.memory_space<vmem>>, vector<32x128xbf16>
    %cst = arith.constant dense<0.000000e+00> : vector<16x128xf32>
    %3 = tpu.matmul %1, %2, %cst {dimension_numbers = #tpu.dot_dimension_numbers<[1], [0], [0], [1], [0, 0, 1, 1], [], []>} : vector<16x32xbf16>, vector<32x128xbf16>, vector<16x128xf32> -> vector<16x128xf32>
    %c0_3 = arith.constant 0 : index
    %c0_4 = arith.constant 0 : index
    %4 = vector.load %arg3[%c0_3, %c0_4] : memref<1x128xf32, #tpu.memory_space<vmem>>, vector<1x128xf32>
    %5 = vector.broadcast %4 : vector<1x128xf32> to vector<16x128xf32>
    %6 = arith.addf %3, %5 : vector<16x128xf32>
    %cst_5 = arith.constant 0.000000e+00 : f32
    %7 = vector.broadcast %cst_5 : f32 to vector<16x128xf32>
    %8 = arith.maximumf %6, %7 : vector<16x128xf32>
    %9 = arith.truncf %8 : vector<16x128xf32> to vector<16x128xbf16>
    %c0_6 = arith.constant 0 : index
    %c0_7 = arith.constant 0 : index
    %10 = vector.load %arg4[%c0_6, %c0_7] : memref<128x64xbf16, #tpu.memory_space<vmem>>, vector<128x64xbf16>
    %cst_8 = arith.constant dense<0.000000e+00> : vector<16x64xf32>
    %11 = tpu.matmul %9, %10, %cst_8 {dimension_numbers = #tpu.dot_dimension_numbers<[1], [0], [0], [1], [0, 0, 1, 1], [], []>} : vector<16x128xbf16>, vector<128x64xbf16>, vector<16x64xf32> -> vector<16x64xf32>
    %c0_9 = arith.constant 0 : index
    %c0_10 = arith.constant 0 : index
    %12 = vector.load %arg5[%c0_9, %c0_10] : memref<1x64xf32, #tpu.memory_space<vmem>>, vector<1x64xf32>
    %13 = vector.broadcast %12 : vector<1x64xf32> to vector<16x64xf32>
    %14 = arith.addf %11, %13 : vector<16x64xf32>
    %cst_11 = arith.constant 0.000000e+00 : f32
    %15 = vector.broadcast %cst_11 : f32 to vector<16x64xf32>
    %16 = arith.maximumf %14, %15 : vector<16x64xf32>
    %17 = arith.truncf %16 : vector<16x64xf32> to vector<16x64xbf16>
    %c0_12 = arith.constant 0 : index
    %c0_13 = arith.constant 0 : index
    %18 = vector.load %arg6[%c0_12, %c0_13] : memref<64x8xbf16, #tpu.memory_space<vmem>>, vector<64x8xbf16>
    %cst_14 = arith.constant dense<0.000000e+00> : vector<16x8xf32>
    %19 = tpu.matmul %17, %18, %cst_14 {dimension_numbers = #tpu.dot_dimension_numbers<[1], [0], [0], [1], [0, 0, 1, 1], [], []>} : vector<16x64xbf16>, vector<64x8xbf16>, vector<16x8xf32> -> vector<16x8xf32>
    %c0_15 = arith.constant 0 : index
    %c0_16 = arith.constant 0 : index
    %20 = vector.load %arg7[%c0_15, %c0_16] : memref<1x8xf32, #tpu.memory_space<vmem>>, vector<1x8xf32>
    %21 = vector.broadcast %20 : vector<1x8xf32> to vector<16x8xf32>
    %22 = arith.addf %19, %21 : vector<16x8xf32>
    %c0_17 = arith.constant 0 : index
    %c0_18 = arith.constant 0 : index
    %23 = vector.load %arg8[%c0_17, %c0_18] : memref<16x8xf32, #tpu.memory_space<vmem>>, vector<16x8xf32>
    tpu.vector_store %arg8[%c0_17, %c0_18], %22 {strides = array<i32>} : memref<16x8xf32, #tpu.memory_space<vmem>>, vector<16x8xf32>,
    return
  }
  func.func @transform_0(%arg0: i32) -> (i32, i32) {
    %c0_i32 = arith.constant 0 : i32
    %c0_i32_0 = arith.constant 0 : i32
    return %arg0, %c0_i32 : i32, i32
  }
  func.func @transform_1(%arg0: i32) -> (i32, i32) {
    %c0_i32 = arith.constant 0 : i32
    %c0_i32_0 = arith.constant 0 : i32
    %c0_i32_1 = arith.constant 0 : i32
    return %c0_i32, %c0_i32_0 : i32, i32
  }
  func.func @transform_2(%arg0: i32) -> (i32, i32) {
    %c0_i32 = arith.constant 0 : i32
    %c0_i32_0 = arith.constant 0 : i32
    %c0_i32_1 = arith.constant 0 : i32
    return %c0_i32, %c0_i32_0 : i32, i32
  }
  func.func @transform_3(%arg0: i32) -> (i32, i32) {
    %c0_i32 = arith.constant 0 : i32
    %c0_i32_0 = arith.constant 0 : i32
    %c0_i32_1 = arith.constant 0 : i32
    return %c0_i32, %c0_i32_0 : i32, i32
  }
  func.func @transform_4(%arg0: i32) -> (i32, i32) {
    %c0_i32 = arith.constant 0 : i32
    %c0_i32_0 = arith.constant 0 : i32
    %c0_i32_1 = arith.constant 0 : i32
    return %c0_i32, %c0_i32_0 : i32, i32
  }
  func.func @transform_5(%arg0: i32) -> (i32, i32) {
    %c0_i32 = arith.constant 0 : i32
    %c0_i32_0 = arith.constant 0 : i32
    %c0_i32_1 = arith.constant 0 : i32
    return %c0_i32, %c0_i32_0 : i32, i32
  }
  func.func @transform_6(%arg0: i32) -> (i32, i32) {
    %c0_i32 = arith.constant 0 : i32
    %c0_i32_0 = arith.constant 0 : i32
    %c0_i32_1 = arith.constant 0 : i32
    return %c0_i32, %c0_i32_0 : i32, i32
  }
  func.func @transform_7(%arg0: i32) -> (i32, i32) {
    %c0_i32 = arith.constant 0 : i32
    %c0_i32_0 = arith.constant 0 : i32
    return %arg0, %c0_i32 : i32, i32
  }
}

</mosaic_0001>

<bundles_post_ra>
// kernel: pg_forward.1
= control target key start
LH: loop header
LB: loop body
LE: loop exit
PB: predicated region body
PF: predicated region fallthrough
CT: control target
= control target key end

     0   :  { %s1133_s24 = smov 0   ;;  %s1135_s25 = smov 0   ;;  %s1287_s0 = inlined_call_operand.vmem [shape: f32[20,32], index: 0, kind: input, shape index: {}]   ;;  %s1288_s1 = inlined_call_operand.vmem [shape: bf16[32,128], index: 1, kind: input, shape index: {}]   ;;  %s1289_s2 = inlined_call_operand.vmem [shape: f32[1,128], index: 2, kind: input, shape index: {}]   ;;  %s1290_s3 = inlined_call_operand.vmem [shape: bf16[128,64], index: 3, kind: input, shape index: {}]   ;;  %s1291_s4 = inlined_call_operand.vmem [shape: f32[1,64], index: 4, kind: input, shape index: {}]   ;;  %s1292_s5 = inlined_call_operand.vmem [shape: bf16[64,8], index: 5, kind: input, shape index: {}]   ;;  %s1293_s6 = inlined_call_operand.vmem [shape: f32[1,8], index: 6, kind: input, shape index: {}]   ;;  %s1294_s7 = inlined_call_operand.vmem [shape: f32[20,8], index: 7, kind: output, shape index: {}]  }
   0x1   :  { %s1137_s26 = smov 0  }
   0x2 LB: > { %s1146_s27 = sadd.s32 4294967295, %s1057_s26   ;;  %s1148_s28 = sadd.s32 1, %s1057_s26   ;;  %s1057_s26 = sphi %s1137_s26, %s1298_s26   ;;  %s1053_s25 = sphi %s1135_s25, %s1297_s25   ;;  %s1049_s24 = sphi %s1133_s24, %s1296_s24  }
   0x3   : > { %s173_s29 = ssub.s32 %s1057_s26, %s1148_s28  ;;  %s176_s30 = sadd.s32 1, %s1053_s25 }
   0x4   : > { %p174_p0 = scmp.eq.s32.totalorder %s173_s29, 0  ;;  %p186_p1 = scmp.ne.s32.totalorder %s1053_s25, %s1049_s24 }
   0x5   : > { %p187_p2 = scmp.eq.s32.totalorder %s1146_s27, 1  ;;  %p799_p3 = scmp.ge.s32.totalorder %s1057_s26, 1 }
   0x6   : > { %s1156_s8 = scalar_select %p174_p0, %s1053_s25, %s176_s30  }
   0x7   : > { %p1158_p4 = por %p187_p2, %p186_p1  ;;  %p246_p5 = scmp.lt.s32.totalorder %s1057_s26, 3 }
   0x9   : > { %p247_p6 = pnand %p799_p3, %p246_p5 }
   0xa   : > { %v989_v0 = vld [vmem:[%s1288_s1] sm:$0xff] (!%p247_p6)   ;;  %v1091_v1 = vmov (!%p247_p6), 0.0   ;;  %v990_v2 = vld [vmem:[%s1288_s1 + $0x8] sm:$0xff] (!%p247_p6)   ;;  %vm1092_vm0 = vmmov (!%p247_p6), 0   ;;  %s1173_s14 = sshll.u32 (!%p247_p6), %s1146_s27, 1  ;;  %v993_v5 = vld [vmem:[%s1290_s3 + $0x10] sm:$0xff] (!%p247_p6)  }
   0xb   : > { %250 = sbr.rel (%p247_p6) target bundleno = 731 (0x2db), region = 48  ;;  %859 = vmatprep.subr.bf16.mxu0 (!%p247_p6), %v1091_v1  ;;  %867 = vmatprep.subr.bf16.mxu1 (!%p247_p6), %v1091_v1  ;;  %p286_p7 = scmp.lt.s32.totalorder (!%p247_p6), %s1173_s14, 2  ;;  %v991_v3 = vld [vmem:[%s1290_s3] sm:$0xff] (!%p247_p6)   ;;  %v992_v4 = vld [vmem:[%s1290_s3 + $0x8] sm:$0xff] (!%p247_p6)   ;;  %vm327_vm1 = vcmask (!%p247_p6), 261120   ;;  %v994_v9 = vld [vmem:[%s1290_s3 + $0x18] sm:$0xff] (!%p247_p6)  }
   0xc   : > { %860 = vmatpush3.bf16.msra.mxu0 (!%p247_p6), %v989_v0  ;;  %863 = vmatprep.mubr.msk.bf16.mxu0 (!%p247_p6), %vm1092_vm0, %v1091_v1  ;;  %v995_v10 = vld [vmem:[%s1290_s3 + $0x20] sm:$0xff] (!%p247_p6)   ;;  %v996_v11 = vld [vmem:[%s1290_s3 + $0x28] sm:$0xff] (!%p247_p6)   ;;  %v997_v12 = vld [vmem:[%s1290_s3 + $0x30] sm:$0xff] (!%p247_p6)   ;;  %vm529_vm2 = vcmask (!%p247_p6), 523264   ;;  %s278_s16 = sand.u32 (!%p247_p6), 1, %s1049_s24   ;;  %vm574_vm3 = vcmask (!%p247_p6), 64512  }
   0xd   : > { %861 = vmatprep.subr.bf16.mxu0 (!%p247_p6), %v1091_v1  ;;  %883 = vmatprep.mubr.msk.bf16.mxu1 (!%p247_p6), %vm1092_vm0, %v1091_v1  ;;  %v998_v13 = vld [vmem:[%s1290_s3 + $0x38] sm:$0xff] (!%p247_p6)   ;;  %v999_v14 = vld [vmem:[%s1292_s5] sm:$0xff] (!%p247_p6)   ;;  %v1000_v15 = vld [vmem:[%s1292_s5 + $0x8] sm:$0xff] (!%p247_p6)  }
   0xe   : > { %868 = vmatpush3.bf16.msra.mxu1 (!%p247_p6), %v991_v3  ;;  %v803_v16 = vld [vmem:[%s1289_s2] ss:$0 sm:$0xff] (!%p247_p6)  ;;  %v1001_v26 = vld [vmem:[%s1292_s5 + $0x10] sm:$0xff] (!%p247_p6)   ;;  %v1002_v27 = vld [vmem:[%s1292_s5 + $0x18] sm:$0xff] (!%p247_p6)  }
   0xf   : > { %869 = vmatprep.subr.bf16.mxu1 (!%p247_p6), %v1091_v1  ;;  %v807_v28 = vld [vmem:[%s1291_s4] ss:$0 sm:$0xff] (!%p247_p6) }
  0x10   : > { %862 = vmatpush3.bf16.msra.mxu0 (!%p247_p6), %v990_v2  ;;  %v816_v38 = vld [vmem:[%s1293_s6] ss:$0 sm:$0xff] (!%p247_p6) }
  0x11   : > { %887 = vmatprep.subr.bf16.mxu0 (!%p247_p6), %v1091_v1 }
  0x12   : > { %s287_s17 = scalar_select %p286_p7, %s1173_s14, 2  ;;  %870 = vmatpush3.bf16.msra.mxu1 %v992_v4 }
  0x13   : > { %871 = vmatprep.subr.bf16.mxu1 %v1091_v1  ;;  %s585_s24 = ssub.s32 (%p1158_p4), 3, %s1173_s14  ;;  %s839_s21 = sshll.u32 (%p1158_p4), %s1146_s27, 4 }
  0x14   : > { %s802_s20 = sshll.u32 %s287_s17, 3  ;;  %s800_s17 = sshll.u32 %s278_s16, 4 }
  0x15   : > { %s289_s23 = scalar_lea.vmem %s1287_s0, %s802_s20  ;;  %s1242_s20 = scalar_lea.vmem [#allocation2], %s800_s17  }
  0x16   : > { %v301_v6 = vld [vmem:[%s289_s23] sm:$0xff]  ;;  %v302_v7 = vld [vmem:[%s289_s23 + $0x8] sm:$0xff]  ;;  %872 = vmatpush3.bf16.msra.mxu1 %v993_v5  ;;  %p586_p8 = scmp.lt.s32.totalorder (%p1158_p4), %s585_s24, 2  ;;  %s1253_s26 = scalar_lea.vmem (%p1158_p4), %s1294_s7, %s839_s21  }
  0x17   : > { %v303_v8 = vpack.c.bf16 %v302_v7, %v301_v6  ;;  %873 = vmatprep.subr.bf16.mxu1 %v1091_v1 }
  0x19   : > { %864 = vmatmul.mubr.msk.bf16.vlgmr.msra.gmra.mrb[0].mxu0 %vm327_vm1, %v303_v8 }
  0x1a   : > { %895 = vmatprep.mubr.msk.bf16.mxu0 %vm1092_vm0, %v1091_v1  ;;  %874 = vmatpush3.bf16.msra.mxu1 %v994_v9 }
  0x1b   : > { %875 = vmatprep.subr.bf16.mxu1 %v1091_v1  ;;  %888 = vmatpush3.bf16.msra.mxu0 %v999_v14 }
  0x1c   : > { %889 = vmatprep.subr.bf16.mxu0 %v1091_v1 }
  0x1e   : > { %876 = vmatpush3.bf16.msra.mxu1 %v995_v10 }
  0x1f   : > { %877 = vmatprep.subr.bf16.mxu1 %v1091_v1  ;;  %890 = vmatpush3.bf16.msra.mxu0 %v1000_v15 }
  0x20   : > { %891 = vmatprep.subr.bf16.mxu0 %v1091_v1 }
  0x22   : > { %878 = vmatpush3.bf16.msra.mxu1 %v996_v11 }
  0x23   : > { %879 = vmatprep.subr.bf16.mxu1 %v1091_v1  ;;  %892 = vmatpush3.bf16.msra.mxu0 %v1001_v26 }
  0x24   : > { %893 = vmatprep.subr.bf16.mxu0 %v1091_v1 }
  0x26   : > { %880 = vmatpush3.bf16.msra.mxu1 %v997_v12 }
  0x27   : > { %881 = vmatprep.subr.bf16.mxu1 %v1091_v1  ;;  %894 = vmatpush3.bf16.msra.mxu0 %v1002_v27 }
  0x2a   : > { %882 = vmatpush3.bf16.msra.mxu1 %v998_v13 }
  0xec   : > { %v365_v17 = vpop.f32.mrb[0].mxu0 }
  0xed   : > { %v366_v18 = vadd.f32 %v803_v16, %v365_v17  ;;  %v865_v19 = vpop.f32.mrb[1].mxu0 }
  0xee   : > { %v368_v20 = vpop.f32.mrb[2].mxu0 }
  0xef   : > { %v369_v21 = vadd.f32 %v803_v16, %v368_v20  ;;  %v866_v22 = vpop.f32.mrb[3].mxu0  ;;  %v372_v23 = vmax.f32 %v366_v18, 0.0 }
  0xf1   : > { %v373_v24 = vmax.f32 %v369_v21, 0.0 }
  0xf3   : > { %v374_v25 = vpack.c.bf16 %v373_v24, %v372_v23 }
  0xf5   : > { %884 = vmatmul.mubr.bf16.vlgmr.msra.gmra.mrb[0].mxu1 %v374_v25 }
 0x1c8   : > { %v480_v29 = vpop.f32.mrb[0].mxu1 }
 0x1c9   : > { %v481_v30 = vadd.f32 %v807_v28, %v480_v29  ;;  %v885_v31 = vpop.f32.mrb[1].mxu1 }
 0x1ca   : > { %v483_v32 = vpop.f32.mrb[2].mxu1 }
 0x1cb   : > { %v484_v33 = vadd.f32 %v807_v28, %v483_v32  ;;  %v886_v34 = vpop.f32.mrb[3].mxu1  ;;  %v487_v35 = vmax.f32 %v481_v30, 0.0 }
 0x1cd   : > { %v488_v36 = vmax.f32 %v484_v33, 0.0 }
 0x1cf   : > { %v489_v37 = vpack.c.bf16 %v488_v36, %v487_v35 }
 0x1d1   : > { %896 = vmatmul.mubr.msk.bf16.vlgmr.msra.gmra.mrb[4].mxu0 %vm529_vm2, %v489_v37 }
 0x2a3   : > { %583 = sbr.rel (!%p1158_p4) target bundleno = 731 (0x2db), region = 52 }
 0x2a4   : > { %v567_v39 = vpop.f32.mrb[4].mxu0 }
 0x2a5   : > { %v568_v40 = vadd.f32 %v816_v38, %v567_v39  ;;  %v897_v41 = vpop.f32.mrb[5].mxu0 }
 0x2a6   : > { %v570_v42 = vpop.f32.mrb[6].mxu0 }
 0x2a7   : > { %575 = vst.msk [vmem:[%s1242_s20] sm:$0xff] %vm574_vm3, %v568_v40  ;;  %v571_v43 = vadd.f32 %v816_v38, %v570_v42  ;;  %v898_v44 = vpop.f32.mrb[7].mxu0 }
 0x2a9   : > { %576 = vst.msk [vmem:[%s1242_s20 + $0x8] sm:$0xff] %vm574_vm3, %v571_v43 }
 0x2aa   : > { %s1300_s24 = smov (!%p586_p8, %s585_s24), 2 }
 0x2ab   : > { %s824_s29 = sshll.u32 %s1300_s24, 7 }
 0x2ac   : > { %p827_p9 = scmp.eq.s32.totalorder %s824_s29, 0 }
 0x2ad   : > { %s1259_s30 = sshrl.u32 (!%p827_p9), %s1300_s24, 1 }
 0x2ae   : > { %594 = sbr.rel (%p827_p9) target bundleno = 731 (0x2db), region = 56  ;;  %p828_p10 = scmp.le.s32.totalorder (!%p827_p9), %s1259_s30, 0 }
 0x2b5   : > { %752 = sbr.rel (%p828_p10) target bundleno = 710 (0x2c6), region = 132  ;;  %s1059_s27 = smov (!%p828_p10), %s1253_s26  }
 0x2b6   : > { %s1063_s9 = smov (!%p828_p10), %s1242_s20   ;;  %s1067_s14 = smov (!%p828_p10), 0  }
 0x2b7   : > { %s1071_s10 = smov (!%p828_p10), 0  }
 0x2bc LB: >> { %v658_v45 = vld [vmem:[%s1065_s9] sm:$0xff]  ;;  %v660_v46 = vld [vmem:[%s1065_s9 + $0x8] sm:$0xff]  ;;  %s662_s11 = sadd.s32 1, %s1069_s14  ;;  %s652_s10 = sadd.s32 1, %s1073_s10   ;;  %s1073_s10 = sphi %s1071_s10, %s652_s10   ;;  %s1069_s14 = sphi %s1067_s14, %s1068_s14   ;;  %s1065_s9 = sphi %s1063_s9, %s667_s9   ;;  %s1061_s27 = sphi %s1059_s27, %s668_s27  }
 0x2bd   : >> { %659 = vst [vmem:[%s1061_s27] sm:$0xff] %v658_v45  ;;  %661 = vst [vmem:[%s1061_s27 + $0x8] sm:$0xff] %v660_v46  ;;  %p663_p11 = scmp.ge.s32.totalorder %s662_s11, %s1259_s30  ;;  %p651_p12 = scmp.ge.s32.totalorder %s652_s10, %s1259_s30 }
 0x2bf   : >> { %s1302_s11 = smov (%p663_p11, %s662_s11), 0  ;;  %654 = sbr.rel (!%p651_p12) target bundleno = 700 (0x2bc), region = 138 }
 0x2c0   : >> { %s829_s12 = sshll.u32 %s1302_s11, 4  ;;  %s1068_s14 = smov %s1302_s11  }
 0x2c1   : >> { %s667_s9 = scalar_lea.vmem %s1242_s20, %s829_s12 [#allocation2]   ;;  %s668_s27 = scalar_lea.vmem %s1253_s26, %s829_s12  }
 0x2c6 PF: > { %s1269_s13 = sand.u32 1, %s1300_s24   ;;  %s840_s15 = sshll.u32 %s1259_s30, 4 }
 0x2c7   : > { %s673_s16 = scalar_lea.vmem %s1242_s20, %s840_s15 [#allocation2]   ;;  %s675_s17 = scalar_lea.vmem %s1253_s26, %s840_s15  }
 0x2c8   : > { %p834_p13 = scmp.le.s32.totalorder %s1269_s13, 0 }
 0x2c9   : > { %s1075_s18 = smov (!%p834_p13), %s675_s17   ;;  %s1079_s19 = smov (!%p834_p13), %s673_s16  }
 0x2ca   : > { %766 = sbr.rel (%p834_p13) target bundleno = 731 (0x2db), region = 143  ;;  %s1083_s21 = smov (!%p834_p13), 0  }
 0x2cb   : > { %s1087_s22 = smov (!%p834_p13), 0  }
 0x2d1 LB: >> { %v685_v47 = vld [vmem:[%s1081_s19] sm:$0xff]  ;;  %s687_s24 = sadd.s32 1, %s1085_s21  ;;  %s679_s22 = sadd.s32 1, %s1089_s22   ;;  %s1089_s22 = sphi %s1087_s22, %s679_s22   ;;  %s1085_s21 = sphi %s1083_s21, %s1084_s21   ;;  %s1081_s19 = sphi %s1079_s19, %s692_s19   ;;  %s1077_s18 = sphi %s1075_s18, %s693_s18  }
 0x2d2   : >> { %686 = vst [vmem:[%s1077_s18] sm:$0xff] %v685_v47  ;;  %p688_p0 = scmp.ge.s32.totalorder %s687_s24, %s1269_s13  ;;  %p678_p1 = scmp.ge.s32.totalorder %s679_s22, %s1269_s13 }
 0x2d4   : >> { %s1304_s24 = smov (%p688_p0, %s687_s24), 0  ;;  %681 = sbr.rel (!%p678_p1) target bundleno = 721 (0x2d1), region = 149 }
 0x2d5   : >> { %s835_s20 = sshll.u32 %s1304_s24, 3  ;;  %s1084_s21 = smov %s1304_s24  }
 0x2d6   : >> { %s692_s19 = scalar_lea.vmem %s673_s16, %s835_s20 [#allocation2]   ;;  %s693_s18 = scalar_lea.vmem %s675_s17, %s835_s20  }
 0x2db PF: > { %p14_p2 = scmp.ge.s32.totalorder %s1148_s28, 4   ;;  %s1296_s24 = smov %s1053_s25 }
 0x2dc   : > { %s1297_s25 = smov %s1156_s8  ;;  %s1298_s26 = smov %s1148_s28 }
 0x2dd   :  { %16 = sbr.rel (!%p14_p2) target bundleno = 2 (0x2), region = 160 }

</bundles_post_ra>
